<compile_context>
chip_gen: v6e
topology: v6e:2x2x1
jax: 0.10.0
libtpu: 0.0.40
codegen_flags: <defaults>
</compile_context>

<pallas_src>
import functools

import jax
import jax.numpy as jnp
from jax import lax
from jax.experimental import pallas as pl
from jax.experimental.pallas import tpu as pltpu


def _largest_divisor_tile(n, candidates):
    for t in candidates:
        if n % t == 0:
            return t
    return n  # tiny / odd sizes: single full-extent tile


# ---------------------------------------------------------------------------
# Stage 1: row-wise L2 normalization, bf16 output.
# ---------------------------------------------------------------------------
def _normalize_kernel(x_ref, o_ref):
    # F.normalize(x, dim=1) (clamp 1e-12) followed by the reference's second
    # clamp-norm (1e-6) collapses to a single rsqrt scale for every row
    # (degenerate zero rows map to zero either way).  rsqrt -> EUP slot.
    x = x_ref[...].astype(jnp.float32)
    ss = jnp.sum(x * x, axis=1, keepdims=True)
    inv = lax.rsqrt(jnp.maximum(ss, 1e-24))
    o_ref[...] = (x * inv).astype(o_ref.dtype)


# ---------------------------------------------------------------------------
# Stage 2: column-tiled SupCon per-row losses.
# ---------------------------------------------------------------------------
def _supcon_loss_kernel(labels_row_ref, labels_col_ref, q_ref, k_ref,
                        loss_rows_ref, num_pos_ref,
                        den_acc, poslogit_acc, cnt_acc, *,
                        inv_temperature, temperature, scale_by_temperature):
    kv = pl.program_id(1)

    @pl.when(kv == 0)
    def _init():
        den_acc[...] = jnp.zeros_like(den_acc)
        poslogit_acc[...] = jnp.zeros_like(poslogit_acc)
        cnt_acc[...] = jnp.zeros_like(cnt_acc)

    q = q_ref[...]                      # [TM, D] bf16 normalized queries
    k = k_ref[...]                      # [TN, D] bf16 normalized key tile
    tm, tn = q.shape[0], k.shape[0]

    # cos_sim / temperature on the MXU (bf16 operands, f32 accumulate),
    # contracting the hidden dim of both operands -> no materialized k.T.
    logits = lax.dot_general(
        q, k, dimension_numbers=(((1,), (1,)), ((), ())),
        preferred_element_type=jnp.float32) * inv_temperature       # [TM, TN]

    # The reference subtracts the per-row max.  With L2-normalized rows the
    # row max is the diagonal cosine == 1, i.e. the CONSTANT 1/temperature,
    # and any per-row shift cancels exactly in logits - log(denominator).
    # Subtracting the constant is mathematically identical, keeps exp()
    # bounded, and removes a full [TM,B] XLU row reduce.  Do not "fix" this
    # back to a jnp.max.
    logits = logits - inv_temperature
    exp_logits = jnp.exp(logits)

    # Boolean masks, built from small broadcast compares; selects instead of
    # float-mask multiplies (fewer VPU passes, fewer live [TM,TN] buffers).
    row = pl.program_id(0) * tm + lax.broadcasted_iota(jnp.int32, (tm, 1), 0)
    col = kv * tn + lax.broadcasted_iota(jnp.int32, (1, tn), 1)
    not_diag = row != col                                            # [TM, TN]
    pos = (labels_row_ref[...] == labels_col_ref[...]) & not_diag    # [TM, TN]

    # negatives + positives == 1 - eye (label-mask diagonal is always 1), so
    # the reference's two masked denominator reductions fuse into one.
    den_acc[...] += jnp.sum(jnp.where(not_diag, exp_logits, 0.0),
                            axis=1, keepdims=True)
    poslogit_acc[...] += jnp.sum(jnp.where(pos, logits, 0.0),
                                 axis=1, keepdims=True)
    cnt_acc[...] += jnp.sum(pos.astype(jnp.float32), axis=1, keepdims=True)

    @pl.when(kv == pl.num_programs(1) - 1)
    def _finalize():
        num_pos = cnt_acc[...]                                        # [TM, 1]
        valid = num_pos > 0.0
        # sum_j pos_ij * (logits_ij - log den_i) without building log_probs.
        sum_pos_log_probs = poslogit_acc[...] - jnp.log(den_acc[...]) * num_pos
        per_row = jnp.where(
            valid, sum_pos_log_probs / jnp.where(valid, num_pos, 1.0), 0.0)
        loss_rows = -per_row
        if scale_by_temperature:
            loss_rows = loss_rows * temperature
        loss_rows_ref[...] = loss_rows
        num_pos_ref[...] = num_pos


def supcon_loss(features, labels, temperature=0.5, scale_by_temperature=True):
    """features: [B, D] float, labels: [B] int -> scalar SupCon loss."""
    B, D = features.shape

    # Stage 1: memory-bound -> big row tiles, bf16 output.
    TR = _largest_divisor_tile(B, (2048, 1024, 512, 256, 128, 64, 32, 16, 8))
    x_norm = pl.pallas_call(
        _normalize_kernel,
        grid=(B // TR,),
        out_shape=jax.ShapeDtypeStruct((B, D), jnp.bfloat16),
        in_specs=[pl.BlockSpec((TR, D), lambda i: (i, 0))],
        out_specs=pl.BlockSpec((TR, D), lambda i: (i, 0)),
        compiler_params=pltpu.CompilerParams(dimension_semantics=("parallel",)),
    )(features)

    # Stage 2 tiling: TM=128 matches the v5e MXU and keeps v7x's 64 MiB VMEM
    # comfortable (v6e could take 256; one portable tiling is kept instead).
    # TN column tiles stream the keys so VMEM usage is independent of B.
    TM = _largest_divisor_tile(B, (128, 64, 32, 16, 8))
    TN = _largest_divisor_tile(B, (2048, 1024, 512, 256, 128))
    num_row_tiles = B // TM
    num_col_tiles = B // TN

    labels_i32 = labels.astype(jnp.int32)
    labels_row = labels_i32.reshape(B, 1)
    labels_col = labels_i32.reshape(1, B)

    kernel = functools.partial(
        _supcon_loss_kernel,
        inv_temperature=1.0 / float(temperature),
        temperature=float(temperature),
        scale_by_temperature=bool(scale_by_temperature),
    )

    # TODO(synk): per-row outputs are kept as (TM,1) blocks (masked partial
    # stores) rather than lane-dense (1,TM) blocks to avoid an in-kernel
    # sublane->lane relayout; measured impact is small since the MXU/VPU
    # region dominates.
    loss_rows, num_pos = pl.pallas_call(
        kernel,
        grid=(num_row_tiles, num_col_tiles),
        out_shape=(jax.ShapeDtypeStruct((B, 1), jnp.float32),
                   jax.ShapeDtypeStruct((B, 1), jnp.float32)),
        in_specs=[
            pl.BlockSpec((TM, 1), lambda i, kv: (i, 0)),   # labels, row tile
            pl.BlockSpec((1, TN), lambda i, kv: (0, kv)),  # labels, column tile
            pl.BlockSpec((TM, D), lambda i, kv: (i, 0)),   # query row tile (bf16)
            pl.BlockSpec((TN, D), lambda i, kv: (kv, 0)),  # key column tile (bf16)
        ],
        out_specs=(pl.BlockSpec((TM, 1), lambda i, kv: (i, 0)),
                   pl.BlockSpec((TM, 1), lambda i, kv: (i, 0))),
        scratch_shapes=[pltpu.VMEM((TM, 1), jnp.float32),   # denominator acc
                        pltpu.VMEM((TM, 1), jnp.float32),   # sum pos logits acc
                        pltpu.VMEM((TM, 1), jnp.float32)],  # positive count acc
        compiler_params=pltpu.CompilerParams(
            dimension_semantics=("parallel", "arbitrary"),
            vmem_limit_bytes=32 * 1024 * 1024),
        cost_estimate=pl.CostEstimate(
            flops=2 * B * B * D,
            transcendentals=B * B,
            bytes_accessed=(num_row_tiles + 1) * B * D * 2 + 2 * B * 4),
    )(labels_row, labels_col, x_norm, x_norm)

    # Scalar epilogue (mean over rows with >=1 positive), kept in plain JAX so
    # the row-tile grid axis stays "parallel" across TensorCores.
    # TODO(synk): like the reference, this yields NaN if no row has a positive.
    valid = (num_pos > 0.0).astype(jnp.float32)
    return jnp.sum(loss_rows) / jnp.sum(valid)


def _supcon_loss_ref(features, labels, temperature=0.5, scale_by_temperature=True):
    """Plain-JAX reference mirroring the PyTorch module (all f32)."""
    x = features.astype(jnp.float32)
    x = x / jnp.maximum(jnp.linalg.norm(x, axis=1, keepdims=True), 1e-12)
    x_norm = x / jnp.maximum(jnp.linalg.norm(x, axis=1, keepdims=True), 1e-6)
    B = x.shape[0]
    adc = (x_norm @ x_norm.T) / temperature
    logits = adc - jnp.max(adc, axis=1, keepdims=True)
    exp_logits = jnp.exp(logits)
    lab = labels.reshape(-1, 1).astype(jnp.float32)
    mask = (lab == lab.T).astype(jnp.float32)
    logits_mask = 1.0 - jnp.eye(B, dtype=jnp.float32)
    pos = mask * logits_mask
    neg = 1.0 - mask
    num_pos = jnp.sum(pos, axis=1)
    den = (jnp.sum(exp_logits * neg, axis=1, keepdims=True)
           + jnp.sum(exp_logits * pos, axis=1, keepdims=True))
    log_probs = logits - jnp.log(den)
    valid = num_pos > 0
    per_row = jnp.where(valid,
                        jnp.sum(log_probs * pos, axis=1) / jnp.where(valid, num_pos, 1.0),
                        0.0)
    loss_rows = -per_row
    if scale_by_temperature:
        loss_rows = loss_rows * temperature
    return jnp.sum(loss_rows) / jnp.sum(valid.astype(jnp.float32))


if __name__ == "__main__":
    key = jax.random.PRNGKey(0)
    k_feat, k_lab = jax.random.split(key)
    B, D = 8, 32
    features = jax.random.normal(k_feat, (B, D), dtype=jnp.float32)
    labels = jax.random.randint(k_lab, (B,), 0, 3, dtype=jnp.int32)

    loss = supcon_loss(features, labels, temperature=0.5, scale_by_temperature=True)
    loss = jax.block_until_ready(loss)

    ref = _supcon_loss_ref(features, labels, temperature=0.5, scale_by_temperature=True)
    # bf16 matmul operands -> tolerance vs the f32 reference is loosened.
    assert jnp.allclose(loss, ref, rtol=3e-2, atol=3e-2), (loss, ref)

    print("KERNEL_OK")
</pallas_src>

<mosaic_0001>
module attributes {stable_mosaic.version = 11 : i64} {
  func.func @_normalize_kernel(%arg0: i32, %arg1: memref<8x32xf32, #tpu.memory_space<vmem>>, %arg2: memref<8x32xbf16, #tpu.memory_space<vmem>>) attributes {dimension_semantics = [#tpu.dimension_semantics<parallel>], iteration_bounds = array<i64: 1>, scalar_prefetch = 0 : i64, scratch_operands = 0 : i64, tpu.core_type = #tpu.core_type<tc>, window_params = [{transform_indices = @transform_0, window_bounds = array<i64: 8, 32>}, {transform_indices = @transform_1, window_bounds = array<i64: 8, 32>}]} {
    %c0 = arith.constant 0 : index
    %c0_0 = arith.constant 0 : index
    %0 = vector.load %arg1[%c0, %c0_0] : memref<8x32xf32, #tpu.memory_space<vmem>>, vector<8x32xf32>
    %1 = arith.mulf %0, %0 : vector<8x32xf32>
    %cst = arith.constant dense<0.000000e+00> : vector<8xf32>
    %2 = vector.multi_reduction <add>, %1, %cst [1] : vector<8x32xf32> to vector<8xf32>
    %3 = vector.shape_cast %2 : vector<8xf32> to vector<8x1xf32>
    %cst_1 = arith.constant 1.000000e-24 : f32
    %4 = vector.broadcast %cst_1 : f32 to vector<8x1xf32>
    %5 = arith.maximumf %3, %4 : vector<8x1xf32>
    %6 = math.rsqrt %5 : vector<8x1xf32>
    %7 = vector.broadcast %6 : vector<8x1xf32> to vector<8x32xf32>
    %8 = arith.mulf %0, %7 : vector<8x32xf32>
    %9 = arith.truncf %8 : vector<8x32xf32> to vector<8x32xbf16>
    %c0_2 = arith.constant 0 : index
    %c0_3 = arith.constant 0 : index
    %10 = vector.load %arg2[%c0_2, %c0_3] : memref<8x32xbf16, #tpu.memory_space<vmem>>, vector<8x32xbf16>
    tpu.vector_store %arg2[%c0_2, %c0_3], %9 {strides = array<i32>} : memref<8x32xbf16, #tpu.memory_space<vmem>>, vector<8x32xbf16>,
    return
  }
  func.func @transform_0(%arg0: i32) -> (i32, i32) {
    %c0_i32 = arith.constant 0 : i32
    %c0_i32_0 = arith.constant 0 : i32
    return %arg0, %c0_i32 : i32, i32
  }
  func.func @transform_1(%arg0: i32) -> (i32, i32) {
    %c0_i32 = arith.constant 0 : i32
    %c0_i32_0 = arith.constant 0 : i32
    return %arg0, %c0_i32 : i32, i32
  }
}

</mosaic_0001>

<bundles_post_ra>
// kernel: tpu_custom_call.1
= control target key start
LH: loop header
LB: loop body
LE: loop exit
PB: predicated region body
PF: predicated region fallthrough
CT: control target
= control target key end

     0   :  { %6 = vsyncpa [#allocation3], 0  ;;  %s114_s0 = inlined_call_operand.hbm [shape: f32[8,32], index: 0, kind: input, shape index: {}]   ;;  %s115_s1 = inlined_call_operand.hbm [shape: bf16[8,32], index: 1, kind: output, shape index: {}]  }
   0x1   :  { %7 = vsyncpa [#allocation4], 0  ;;  %s96_s6 = smov [#allocation2]  }
   0x2   :  { %s14_s7 = sshll.u32 %s96_s6, 4  ;;  %s15_s7 = int_to_ptr.vmem [resolvable:$true] %s14_s7 }
   0x3   :  { %s60_s8 = scalar_lea.vmem %s15_s7, 128  ;;  %p65_p1 = scmp.lt.s32.totalorder %s15_s7, %s15_s7 }
   0x4   :  { %p61_p0 = scmp.ne.s32.totalorder %s15_s7, %s60_s8  ;;  %p66_p2 = scmp.lt.s32.totalorder %s60_s8, %s60_s8 }
   0x6   :  { %p67_p3 = por %p66_p2, %p65_p1 }
   0x8   :  { %p68_p4 = pnand %p67_p3, %p61_p0 }
   0xa   :  { %71 = shalt.err (!%p68_p4)
}
   0xb   :  { %17 = dma.hbm_to_vmem [thread:$0]  %s114_s0, 128, %s15_s7, [#allocation3]  }
   0xc   :  { %92 = dma.done.wait [#allocation3], 128  }
   0xd   :  { %93 = vsyncadd [#allocation3], 4294967168  ;;  %v21_v0 = vld [vmem:[#allocation2] sm:$0xff]  ;;  %vm23_vm0 = vcmask 261120   ;;  %s97_s11 = smov [#allocation5]   ;;  %vm31_vm1 = vcmask 257024  }
   0xe   :  { %v22_v1 = vmul.f32 %v21_v0, %v21_v0  ;;  %s39_s12 = sshll.u32 %s97_s11, 4  ;;  %s40_s12 = int_to_ptr.vmem [resolvable:$true] %s39_s12 }
   0xf   :  { %s72_s13 = scalar_lea.vmem %s40_s12, 64  ;;  %p77_p6 = scmp.lt.s32.totalorder %s40_s12, %s40_s12 }
  0x10   :  { %v24_v2 = vsel %vm23_vm0, %v22_v1, 0.0  ;;  %p73_p5 = scmp.ne.s32.totalorder %s40_s12, %s72_s13  ;;  %p78_p7 = scmp.lt.s32.totalorder %s72_s13, %s72_s13 }
  0x11   :  { %25 = vadd.xlane.f32.xlu0 %v24_v2 }
  0x12   :  { %p79_p8 = por %p78_p7, %p77_p6 }
  0x14   :  { %p80_p9 = pnand %p79_p8, %p73_p5 }
  0x9a   :  { %v26_v3 = vpop.xlane.xlu0 %25 }
  0x9b   :  { %v27_v4 = vmax.f32 %v26_v3, 1e-24 }
  0x9d   :  { %50 = vrsqrt.f32 %v27_v4 }
  0xaa   :  { %v51_v5 = vpop.eup %50 }
  0xab   :  { %v29_v6 = vmul.f32 %v51_v5, %v21_v0 }
  0xad   :  { %v30_v7 = vpack.c.bf16 %v29_v6, %v29_v6 }
  0xaf   :  { %32 = vst.msk [vmem:[#allocation5] sm:$0xf] %vm31_vm1, %v30_v7 }
  0xb0   :  { %83 = shalt.err (!%p80_p9)
}
  0xb1   :  { %42 = dma.vmem_to_hbm [thread:$0]  %s40_s12, 64, %s115_s1, [#allocation4]  }
  0xb2   :  { %94 = dma.done.wait [#allocation4], 64  }
  0xb3   :  { %95 = vsyncadd [#allocation4], 4294967232 }
  0xb4   :  { %46 = vsyncpa [#allocation3], 1 }
  0xb5   :  { %47 = vsyncpa [#allocation4], 1 }

</bundles_post_ra>
